<compile_context>
chip_gen: v7x
topology: tpu7x:2x2x1
jax: 0.10.0
libtpu: 0.0.40
codegen_flags: <defaults>
</compile_context>

<pallas_src>
import functools

import jax
import jax.numpy as jnp
from jax.experimental import pallas as pl
from jax.experimental.pallas import tpu as pltpu


def _round_up(x, m):
    return (x + m - 1) // m * m


def _cdiv(a, b):
    return (a + b - 1) // b


# -------------------------------------------------------------------------
# Pallas kernel: one (tile_m, K) x (K, N) matmul tile + bias add.
# A / W arrive as bf16, accumulation and the stored output are f32.
# -------------------------------------------------------------------------
def _matmul_bias_kernel(a_ref, w_ref, b_ref, o_ref):
    o_ref[...] = (
        jnp.dot(a_ref[...], w_ref[...], preferred_element_type=jnp.float32)
        + b_ref[...]
    )


_VMEM_BLOCK_BUDGET = 32 * 1024 * 1024   # per-step block budget (bytes)
_VMEM_LIMIT = 48 * 1024 * 1024          # scoped VMEM limit handed to Mosaic
_MAX_TILE_M = 2048


def _pick_m_tiling(M_pad, K, N):
    """Largest tile_m (multiple of 8, <= _MAX_TILE_M) within the VMEM budget,
    with a grid length that is even (v7x megacore) and avoids padded rows."""
    # Per-step VMEM: A (bf16) + out (f32) double-buffered, weight (bf16) +
    # bias (f32) double-buffered (constant block index -> fetched once).
    bytes_per_row = 2 * (K * 2) + 2 * (N * 4)
    fixed = 2 * (K * N * 2) + 2 * (N * 4)
    avail = max(_VMEM_BLOCK_BUDGET - fixed, 1 << 20)
    cap = max(8, min(_MAX_TILE_M, (avail // bytes_per_row) // 8 * 8))
    cap = min(cap, M_pad)

    # >= 2 grid steps when M allows (pipeline depth); prefer zero padded rows,
    # then an even step count, then the fewest steps.
    nt_min = max(_cdiv(M_pad, cap), 2 if M_pad >= 16 else 1)
    best = None
    for nt in range(nt_min, nt_min + 64):
        tm = _round_up(_cdiv(M_pad, nt), 8)
        nt_act = _cdiv(M_pad, tm)
        pad = nt_act * tm - M_pad
        uneven = 0 if (nt_act % 2 == 0 or nt_act == 1) else 1
        score = (pad, uneven, nt_act)
        if best is None or score < best[0]:
            best = (score, tm, nt_act)
        if pad == 0 and uneven == 0:
            break
    _, tile_m, num_tiles = best
    return tile_m, num_tiles


def _matmul_bias(a, w, b):
    """out = a @ w + b.  a: (M, K), w: (K, N), b: (N,).  Tiled over M."""
    M, K = a.shape
    K2, N = w.shape
    assert K == K2, (K, K2)

    a = a.astype(jnp.bfloat16)
    w = w.astype(jnp.bfloat16)
    b2 = b.astype(jnp.float32).reshape(1, N)

    M_pad = _round_up(M, 8)
    tile_m, num_tiles = _pick_m_tiling(M_pad, K, N)
    M_pad = num_tiles * tile_m

    a_pad = a if M_pad == M else jnp.pad(a, ((0, M_pad - M), (0, 0)))

    out = pl.pallas_call(
        _matmul_bias_kernel,
        out_shape=jax.ShapeDtypeStruct((M_pad, N), jnp.float32),
        grid=(num_tiles,),
        in_specs=[
            pl.BlockSpec((tile_m, K), lambda i: (i, 0)),   # A tile (streamed)
            pl.BlockSpec((K, N), lambda i: (0, 0)),        # weight (resident)
            pl.BlockSpec((1, N), lambda i: (0, 0)),        # bias   (resident)
        ],
        out_specs=pl.BlockSpec((tile_m, N), lambda i: (i, 0)),
        compiler_params=pltpu.CompilerParams(
            dimension_semantics=("parallel",),
            vmem_limit_bytes=_VMEM_LIMIT,
        ),
    )(a_pad, w, b2)
    if M_pad != M:
        out = out[:M, :]
    return out


# -------------------------------------------------------------------------
# PatchEmbed forward
# -------------------------------------------------------------------------
def patch_embed(x, w, b, *, kernel=(7, 7), stride=(4, 4), padding=(3, 3)):
    """Equivalent of:
         y = Conv2d(Cin, Cout, kernel, stride, padding)(x)
         return y.flatten(2).transpose(1, 2), y.shape
       x: (B, Cin, H, W), w: (Cout, Cin, kh, kw), b: (Cout,)
    """
    B, Cin, H, W = x.shape
    Cout = w.shape[0]
    kh, kw = kernel
    sh, sw = stride
    ph, pw = padding
    Ho = (H + 2 * ph - kh) // sh + 1
    Wo = (W + 2 * pw - kw) // sw + 1

    # im2col slab, generated lane-major (NHWC window slices concatenated on the
    # last/channel axis) and born directly in bf16 at its exact K width.
    x_nhwc = jnp.transpose(x, (0, 2, 3, 1)).astype(jnp.bfloat16)
    xp = jnp.pad(x_nhwc, ((0, 0), (ph, ph), (pw, pw), (0, 0)))
    cols = [xp[:, i:i + sh * Ho:sh, j:j + sw * Wo:sw, :]
            for i in range(kh) for j in range(kw)]
    col = jnp.concatenate(cols, axis=-1).reshape(B * Ho * Wo, kh * kw * Cin)

    # Reorder the conv weight to match col's K order: ((i, j), cin), cin fastest.
    w2d = jnp.transpose(w, (2, 3, 1, 0)).reshape(kh * kw * Cin, Cout)

    out = _matmul_bias(col, w2d, b)                # (B*Ho*Wo, Cout) f32
    tokens = out.reshape(B, Ho * Wo, Cout)         # == y.flatten(2).transpose(1, 2)
    conv_shape = (B, Cout, Ho, Wo)                 # == y.shape
    return tokens, conv_shape


# -------------------------------------------------------------------------
if __name__ == "__main__":
    key = jax.random.PRNGKey(0)
    k_x, k_w, k_b = jax.random.split(key, 3)

    # Small shapes consistent with the module (Conv2d k=7, s=4, p=3).
    B, CIN, S = 2, 4, 16
    COUT = 128                     # multiple of 128 -> lane-dense output stores
    KERNEL, STRIDE, PAD = (7, 7), (4, 4), (3, 3)

    x = jax.random.normal(k_x, (B, CIN, S, S), jnp.float32)
    w = 0.02 * jax.random.normal(k_w, (COUT, CIN, KERNEL[0], KERNEL[1]), jnp.float32)
    b = 0.01 * jax.random.normal(k_b, (COUT,), jnp.float32)

    fwd = jax.jit(functools.partial(patch_embed, kernel=KERNEL,
                                    stride=STRIDE, padding=PAD))
    tokens, conv_shape = fwd(x, w, b)
    jax.block_until_ready(tokens)
    conv_shape = tuple(int(d) for d in conv_shape)

    Ho = (S + 2 * PAD[0] - KERNEL[0]) // STRIDE[0] + 1
    Wo = (S + 2 * PAD[1] - KERNEL[1]) // STRIDE[1] + 1
    assert tokens.shape == (B, Ho * Wo, COUT), tokens.shape
    assert conv_shape == (B, COUT, Ho, Wo), conv_shape

    # Correctness check against XLA's conv (tolerance covers bf16 operand
    # rounding; accumulation is f32 on both sides).
    ref = jax.lax.conv_general_dilated(
        x, w, window_strides=STRIDE,
        padding=[(PAD[0], PAD[0]), (PAD[1], PAD[1])],
        dimension_numbers=("NCHW", "OIHW", "NCHW"))
    ref = ref + b.reshape(1, COUT, 1, 1)
    ref_tokens = jnp.transpose(ref.reshape(B, COUT, Ho * Wo), (0, 2, 1))
    max_err = float(jnp.max(jnp.abs(tokens - ref_tokens)))
    assert max_err < 2e-2, max_err

    print("KERNEL_OK")
</pallas_src>

<mosaic_0001>
module attributes {stable_mosaic.version = 11 : i64} {
  func.func @_matmul_bias_kernel(%arg0: i32, %arg1: memref<16x196xbf16, #tpu.memory_space<vmem>>, %arg2: memref<196x128xbf16, #tpu.memory_space<vmem>>, %arg3: memref<1x128xf32, #tpu.memory_space<vmem>>, %arg4: memref<16x128xf32, #tpu.memory_space<vmem>>) attributes {dimension_semantics = [#tpu.dimension_semantics<parallel>], iteration_bounds = array<i64: 2>, scalar_prefetch = 0 : i64, scratch_operands = 0 : i64, tpu.core_type = #tpu.core_type<tc>, window_params = [{transform_indices = @transform_0, window_bounds = array<i64: 16, 196>}, {pipeline_mode = #tpu.pipeline_mode<synchronous>, transform_indices = @transform_1, window_bounds = array<i64: 196, 128>}, {pipeline_mode = #tpu.pipeline_mode<synchronous>, transform_indices = @transform_2, window_bounds = array<i64: 1, 128>}, {transform_indices = @transform_3, window_bounds = array<i64: 16, 128>}]} {
    %c0 = arith.constant 0 : index
    %c0_0 = arith.constant 0 : index
    %0 = vector.load %arg1[%c0, %c0_0] : memref<16x196xbf16, #tpu.memory_space<vmem>>, vector<16x196xbf16>
    %c0_1 = arith.constant 0 : index
    %c0_2 = arith.constant 0 : index
    %1 = vector.load %arg2[%c0_1, %c0_2] : memref<196x128xbf16, #tpu.memory_space<vmem>>, vector<196x128xbf16>
    %cst = arith.constant dense<0.000000e+00> : vector<16x128xf32>
    %2 = tpu.matmul %0, %1, %cst {dimension_numbers = #tpu.dot_dimension_numbers<[1], [0], [0], [1], [0, 0, 1, 1], [], []>} : vector<16x196xbf16>, vector<196x128xbf16>, vector<16x128xf32> -> vector<16x128xf32>
    %c0_3 = arith.constant 0 : index
    %c0_4 = arith.constant 0 : index
    %3 = vector.load %arg3[%c0_3, %c0_4] : memref<1x128xf32, #tpu.memory_space<vmem>>, vector<1x128xf32>
    %4 = vector.broadcast %3 : vector<1x128xf32> to vector<16x128xf32>
    %5 = arith.addf %2, %4 : vector<16x128xf32>
    %c0_5 = arith.constant 0 : index
    %c0_6 = arith.constant 0 : index
    %6 = vector.load %arg4[%c0_5, %c0_6] : memref<16x128xf32, #tpu.memory_space<vmem>>, vector<16x128xf32>
    tpu.vector_store %arg4[%c0_5, %c0_6], %5 {strides = array<i32>} : memref<16x128xf32, #tpu.memory_space<vmem>>, vector<16x128xf32>,
    return
  }
  func.func @transform_0(%arg0: i32) -> (i32, i32) {
    %c0_i32 = arith.constant 0 : i32
    %c0_i32_0 = arith.constant 0 : i32
    return %arg0, %c0_i32 : i32, i32
  }
  func.func @transform_1(%arg0: i32) -> (i32, i32) {
    %c0_i32 = arith.constant 0 : i32
    %c0_i32_0 = arith.constant 0 : i32
    %c0_i32_1 = arith.constant 0 : i32
    return %c0_i32, %c0_i32_0 : i32, i32
  }
  func.func @transform_2(%arg0: i32) -> (i32, i32) {
    %c0_i32 = arith.constant 0 : i32
    %c0_i32_0 = arith.constant 0 : i32
    %c0_i32_1 = arith.constant 0 : i32
    return %c0_i32, %c0_i32_0 : i32, i32
  }
  func.func @transform_3(%arg0: i32) -> (i32, i32) {
    %c0_i32 = arith.constant 0 : i32
    %c0_i32_0 = arith.constant 0 : i32
    return %arg0, %c0_i32 : i32, i32
  }
}

</mosaic_0001>

<bundles_post_ra>
// kernel: patch_embed.1
= control target key start
LH: loop header
LB: loop body
LE: loop exit
PB: predicated region body
PF: predicated region fallthrough
CT: control target
= control target key end

     0   :  { %8 = vsyncpa [#allocation3], 0  ;;  %s747_s0 = inlined_call_operand.vmem [shape: bf16[32,196], index: 0, kind: input, shape index: {}]   ;;  %s748_s1 = inlined_call_operand.vmem [shape: bf16[196,128], index: 1, kind: input, shape index: {}]   ;;  %s749_s2 = inlined_call_operand.vmem [shape: f32[1,128], index: 2, kind: input, shape index: {}]   ;;  %s750_s3 = inlined_call_operand.hbm [shape: f32[32,128], index: 3, kind: output, shape index: {}]  }
   0x1   :  { %10 = vsyncpa [#allocation3 + $0x1], 0  ;;  %s599_s12 = smov 0   ;;  %s601_s13 = smov 0  }
   0x2   :  { %s603_s14 = smov 0   ;;  %s605_s15 = smov 0  }
   0x3 LB: > { %s620_s16 = sadd.s32 4294967295, %s573_s15   ;;  %s421_s17 = sadd.s32 4294967294, %s573_s15   ;;  %s573_s15 = sphi %s605_s15, %s756_s15   ;;  %s569_s14 = sphi %s603_s14, %s755_s14   ;;  %s565_s13 = sphi %s601_s13, %s754_s13   ;;  %s561_s12 = sphi %s599_s12, %s753_s12  }
   0x4   : > { %s624_s18 = sadd.s32 1, %s573_s15   ;;  %s91_s19 = sadd.s32 1, %s569_s14 }
   0x5   : > { %s88_s20 = ssub.s32 %s573_s15, %s624_s18  ;;  %p101_p0 = scmp.ne.s32.totalorder %s569_s14, %s565_s13 }
   0x6   : > { %p89_p1 = scmp.eq.s32.totalorder %s88_s20, 0  ;;  %p102_p2 = scmp.eq.s32.totalorder %s620_s16, 1 }
   0x7   : > { %p107_p3 = scmp.ne.s32.totalorder %s565_s13, %s561_s12  ;;  %p108_p4 = scmp.eq.s32.totalorder %s421_s17, 1 }
   0x8   : > { %s635_s21 = scalar_select %p89_p1, %s569_s14, %s91_s19  }
   0x9   : > { %p637_p5 = por %p102_p2, %p101_p0  ;;  %p641_p6 = por %p108_p4, %p107_p3 }
   0xa   : > { %p424_p7 = scmp.ge.s32.totalorder %s573_s15, 1  ;;  %p142_p8 = scmp.lt.s32.totalorder %s573_s15, 3 }
   0xc   : > { %p143_p9 = pnand %p424_p7, %p142_p8 }
   0xd   : > { %v495_v0 = vld [vmem:[%s748_s1] sm:$0xff] (!%p143_p9)   ;;  %v575_v1 = vmov (!%p143_p9), 0   ;;  %v496_v2 = vld [vmem:[%s748_s1 + $0x8] sm:$0xff] (!%p143_p9)   ;;  %s426_s28 = sshll.u32 (!%p143_p9), %s620_s16, 1  ;;  %v497_v3 = vld [vmem:[%s748_s1 + $0x10] sm:$0xff] (!%p143_p9)   ;;  %vm294_vm0 = vcmask (!%p143_p9), 556032  }
   0xe   : > { %146 = sbr.rel (%p143_p9) target bundleno = 297 (0x129), region = 32  ;;  %302 = vmatprep.subr.bf16.mxu0 (!%p143_p9), %v575_v1  ;;  %p168_p10 = scmp.lt.s32.totalorder (!%p143_p9), %s426_s28, 3  ;;  %v498_v4 = vld [vmem:[%s748_s1 + $0x18] sm:$0xff] (!%p143_p9)   ;;  %v499_v6 = vld [vmem:[%s748_s1 + $0x20] sm:$0xff] (!%p143_p9)   ;;  %v500_v7 = vld [vmem:[%s748_s1 + $0x28] sm:$0xff] (!%p143_p9)   ;;  %vm298_vm1 = vcmask (!%p143_p9), 1041408  }
   0xf   : > { %303 = vmatpush1.bf16.msra.mxu0 (!%p143_p9), %v495_v0  ;;  %v501_v8 = vld [vmem:[%s748_s1 + $0x30] sm:$0xff] (!%p143_p9)   ;;  %v502_v9 = vld [vmem:[%s748_s1 + $0x38] sm:$0xff] (!%p143_p9)   ;;  %v503_v10 = vld [vmem:[%s748_s1 + $0x40] sm:$0xff] (!%p143_p9)   ;;  %s164_s11 = sand.u32 (!%p143_p9), 1, %s565_s13   ;;  %s452_s26 = sshll.u32 (!%p143_p9), %s620_s16, 8 }
  0x10   : > { %304 = vmatprep.subr.bf16.mxu0 (!%p143_p9), %v575_v1  ;;  %v504_v11 = vld [vmem:[%s748_s1 + $0x48] sm:$0xff] (!%p143_p9)   ;;  %v505_v12 = vld [vmem:[%s748_s1 + $0x50] sm:$0xff] (!%p143_p9)   ;;  %v506_v13 = vld [vmem:[%s748_s1 + $0x58] sm:$0xff] (!%p143_p9)   ;;  %s425_s17 = sshll.u32 (!%p143_p9), %s164_s11, 4  ;;  %s706_s29 = scalar_lea.sflag (!%p143_p9), [#allocation3], %s164_s11 }
  0x11   : > { %v507_v14 = vld [vmem:[%s748_s1 + $0x60] ss:$0 sps:$4 sm:$0x33] (!%p143_p9)   ;;  %s166_s24 = scalar_lea.vmem (!%p143_p9), [#allocation2], %s425_s17  ;;  %s576_s30 = smov (!%p143_p9), [#allocation2]  }
  0x12   : > { %v300_v15 = vsel (!%p143_p9), %vm298_vm1, %v507_v14, 0  ;;  %v429_v17 = vld [vmem:[%s749_s2] ss:$0 sm:$0xff] (!%p143_p9)  ;;  %s359_s25 = sshll.u32 (!%p143_p9), %s166_s24, 4  ;;  %s699_s25 = int_to_ptr.vmem [resolvable:$true] %s359_s25 }
  0x13   : > { %305 = vmatpush1.bf16.msra.mxu0 (!%p143_p9), %v496_v2  ;;  %s511_s16 = scalar_lea.vmem (!%p143_p9), %s699_s25, 256 }
  0x14   : > { %306 = vmatprep.subr.bf16.mxu0 (!%p143_p9), %v575_v1  ;;  %p512_p11 = scmp.ne.s32.totalorder (!%p143_p9), %s699_s25, %s511_s16 }
  0x15   : > { %s758_s28 = smov (!%p168_p10, %s426_s28), 3 }
  0x16   : > { %s451_s4 = sshll.u32 %s758_s28, 3  ;;  %s704_s28 = scalar_lea.hbm %s750_s3, %s452_s26 }
  0x17   : > { %307 = vmatpush1.bf16.msra.mxu0 %v497_v3  ;;  %s663_s9 = scalar_lea.vmem %s747_s0, %s451_s4  ;;  %p513_p12 = pnand %p512_p11, %p637_p5 }
  0x18   : > { %308 = vmatprep.subr.bf16.mxu0 %v575_v1  ;;  %v510_v5 = vld [vmem:[%s663_s9 + $0x4] ss:$8 sps:$4 sm:$0xff]   ;;  %v508_v16 = vld [vmem:[%s663_s9] ss:$8 sps:$4 sm:$0xff]   ;;  %s515_s4 = sshll.u32 %s576_s30, 4  ;;  %s516_s4 = int_to_ptr.vmem [resolvable:$false] %s515_s4 }
  0x19   : > { %445 = vmatprep.mubr.msk.bf16.mxu0 %vm294_vm0, %v510_v5  ;;  %p514_p13 = pneg %p513_p12  ;;  %s517_s5 = scalar_lea.vmem %s516_s4, 512 }
  0x1a   : > { %p518_p0 = scmp.lt.s32.totalorder %s699_s25, %s516_s4  ;;  %p519_p1 = scmp.lt.s32.totalorder %s517_s5, %s511_s16 }
  0x1b   : > { %309 = vmatpush1.bf16.msra.mxu0 %v498_v4 }
  0x1c   : > { %310 = vmatprep.subr.bf16.mxu0 %v575_v1  ;;  %p520_p2 = por %p519_p1, %p518_p0 }
  0x1e   : > { %p521_p3 = pnand %p520_p2, %p514_p13 }
  0x1f   : > { %311 = vmatpush1.bf16.msra.mxu0 %v499_v6 }
  0x20   : > { %312 = vmatprep.subr.bf16.mxu0 %v575_v1 }
  0x23   : > { %313 = vmatpush1.bf16.msra.mxu0 %v500_v7 }
  0x24   : > { %314 = vmatprep.subr.bf16.mxu0 %v575_v1 }
  0x27   : > { %315 = vmatpush1.bf16.msra.mxu0 %v501_v8 }
  0x28   : > { %316 = vmatprep.subr.bf16.mxu0 %v575_v1 }
  0x2b   : > { %317 = vmatpush1.bf16.msra.mxu0 %v502_v9 }
  0x2c   : > { %318 = vmatprep.subr.bf16.mxu0 %v575_v1 }
  0x2f   : > { %319 = vmatpush1.bf16.msra.mxu0 %v503_v10 }
  0x30   : > { %320 = vmatprep.subr.bf16.mxu0 %v575_v1 }
  0x33   : > { %321 = vmatpush1.bf16.msra.mxu0 %v504_v11 }
  0x34   : > { %322 = vmatprep.subr.bf16.mxu0 %v575_v1 }
  0x37   : > { %323 = vmatpush1.bf16.msra.mxu0 %v505_v12 }
  0x38   : > { %324 = vmatprep.subr.bf16.mxu0 %v575_v1 }
  0x3b   : > { %325 = vmatpush1.bf16.msra.mxu0 %v506_v13 }
  0x3c   : > { %326 = vmatprep.subr.bf16.mxu0 %v575_v1 }
  0x3f   : > { %327 = vmatpush1.bf16.msra.mxu0 %v300_v15 }
  0x42   : > { %335 = vmatmul.mubr.bf16.vlgmr.msra.gmra.mrb[0].mxu0 %v508_v16 }
 0x115   : > { %v336_v18 = vpop.f32.mrb[0].mxu0 }
 0x116   : > { %v337_v19 = vadd.f32 %v429_v17, %v336_v18  ;;  %v338_v20 = vpop.f32.mrb[1].mxu0 }
 0x117   : > { %v339_v21 = vpop.f32.mrb[2].mxu0 }
 0x118   : > { %343 = vst [vmem:[%s166_s24] sm:$0xff] %v337_v19  ;;  %v340_v22 = vadd.f32 %v429_v17, %v339_v21  ;;  %v341_v23 = vpop.f32.mrb[3].mxu0 }
 0x11a   : > { %344 = vst [vmem:[%s166_s24 + $0x8] sm:$0xff] %v340_v22 }
 0x11b   : > { %524 = shalt.err (!%p521_p3)
}
 0x11c   : > { %s525_s6 = scalar_lea.hbm %s704_s28, 256  ;;  %s529_s10 = scalar_lea.hbm %s750_s3, 512 }
 0x11d   : > { %p526_p4 = scmp.ne.s32.totalorder %s704_s28, %s525_s6  ;;  %p530_p9 = scmp.lt.u32.totalorder %s704_s28, %s750_s3 }
 0x11e   : > { %p531_p10 = scmp.lt.u32.totalorder %s529_s10, %s525_s6  ;;  %p533_p12 = scmp.lt.u32.totalorder %s525_s6, %s704_s28 }
 0x11f   : > { %p527_p7 = pnand %p526_p4, %p637_p5 }
 0x120   : > { %p532_p11 = por %p531_p10, %p530_p9 }
 0x121   : > { %p528_p8 = pneg %p527_p7 }
 0x122   : > { %p534_p13 = por %p533_p12, %p532_p11 }
 0x124   : > { %p535_p0 = pnand %p534_p13, %p528_p8 }
 0x126   : > { %538 = shalt.err (!%p535_p0)
}
 0x127   : > { %s577_s19 = smov 128   ;;  %s578_s20 = smov 8  }
 0x128   : > { %453 = dma.vmem_to_hbm [thread:$0]  (%p637_p5), %s699_s25, 256, %s704_s28, %s706_s29, %s577_s19, %s577_s19, %s578_s20  }
 0x129 PF: > { %p459_p1 = scmp.ge.s32.totalorder %s573_s15, 2  ;;  %s374_s24 = sand.u32 1, %s561_s12  }
 0x12a   : > { %s375_s26 = scalar_lea.sflag [#allocation3], %s374_s24 }
 0x12b   : > { %p456_p2 = pnand %p459_p1, %p641_p6 }
 0x12d   : > { %556 = dma.done.wait (!%p456_p2), %s375_s26, 256  }
 0x12e   : > { %558 = vsyncadd (!%p456_p2), %s375_s26, 4294967040  ;;  %p13_p3 = scmp.ge.s32.totalorder %s624_s18, 4   ;;  %s753_s12 = smov %s565_s13 }
 0x12f   : > { %s754_s13 = smov %s569_s14  ;;  %s755_s14 = smov %s635_s21 }
 0x130   : > { %s756_s15 = smov %s624_s18  ;;  %15 = sbr.rel (!%p13_p3) target bundleno = 3 (0x3), region = 67 }
 0x137   :  { %380 = vsyncpa [#allocation3], 1 }
 0x138   :  { %382 = vsyncpa [#allocation3 + $0x1], 1 }

</bundles_post_ra>
